<compile_context>
chip_gen: v7x
topology: tpu7x:2x2x1
jax: 0.10.0
libtpu: 0.0.40
codegen_flags: <defaults>
</compile_context>

<pallas_src>
import jax
import jax.numpy as jnp
from jax import lax
from jax.experimental import pallas as pl
from jax.experimental.pallas import tpu as pltpu


def pooler_kernel(x_ref, w_ref, b_ref, o_ref):
    # x_ref: (bm, D)  first-token rows, compute dtype (bf16 or f32)
    # w_ref: (bn, D)  raw PyTorch-layout weight tile (out, in) -- NOT transposed
    # b_ref: (1, bn)  f32 bias tile
    # o_ref: (bm, bn)
    y = lax.dot_general(
        x_ref[...], w_ref[...],
        dimension_numbers=(((1,), (1,)), ((), ())),   # contract the "in" dim of both
        preferred_element_type=jnp.float32,
    )
    y = y + b_ref[...]
    o_ref[...] = jnp.maximum(y, 0.0).astype(o_ref.dtype)


def _n_col_split(D):
    """2-way output-column split only on v7x (2 TensorCores) when D allows it."""
    try:
        kind = jax.devices()[0].device_kind.lower()
    except Exception:
        return 1
    if ("v7" in kind or "7x" in kind) and D % 256 == 0:
        return 2
    return 1


def distilbert_pooler(hidden_states, weight, bias):
    """hidden_states: (B, S, D); weight: (D, D) PyTorch (out, in); bias: (D,).

    `weight` should be stored (once, at init) in the desired compute dtype
    (e.g. bf16); it is streamed untransposed and unpadded.
    """
    B, S, D = hidden_states.shape
    assert weight.shape == (D, D) and bias.shape == (D,)
    out_dtype = hidden_states.dtype

    # First-token slice -> contiguous (B, D).  Tiny next to the weight stream.
    x = hidden_states[:, 0, :]
    if x.dtype != weight.dtype:
        x = x.astype(weight.dtype)          # compute dtype follows the stored weight
    b2d = bias.reshape(1, D).astype(jnp.float32)

    # Row tiling: whole batch in one tile when it fits, else 128-row tiles
    # (Pallas masks the partial edge block -- no row padding).
    if B <= 128:
        bm, n_row = B, 1
    else:
        bm, n_row = 128, pl.cdiv(B, 128)

    # Output-column tiling: one block (one grid step) except the v7x 2-way split.
    n_col = _n_col_split(D)
    bn = D // n_col

    # Columns outer, rows inner: weight block index depends only on the column
    # tile -> the DxD weight is streamed from HBM exactly once.
    grid = (n_col, n_row)

    cost = pl.CostEstimate(
        flops=2 * B * D * D,
        transcendentals=0,
        bytes_accessed=(D * D * weight.dtype.itemsize            # weight, once
                        + n_col * B * D * x.dtype.itemsize       # x, per column tile
                        + B * D * jnp.dtype(out_dtype).itemsize  # output
                        + D * 4),                                # bias
    )

    out = pl.pallas_call(
        pooler_kernel,
        out_shape=jax.ShapeDtypeStruct((B, D), out_dtype),
        grid_spec=pltpu.PrefetchScalarGridSpec(
            num_scalar_prefetch=0,
            grid=grid,
            in_specs=[
                pl.BlockSpec((bm, D), lambda j, i: (i, 0)),   # x rows
                pl.BlockSpec((bn, D), lambda j, i: (j, 0)),   # raw weight rows (= out cols)
                pl.BlockSpec((1, bn), lambda j, i: (0, j)),   # bias tile (resident if n_col==1)
            ],
            out_specs=pl.BlockSpec((bm, bn), lambda j, i: (i, j)),
        ),
        compiler_params=pltpu.CompilerParams(
            dimension_semantics=("parallel", "parallel")),
        cost_estimate=cost,
    )(x, weight, b2d)

    return out


if __name__ == "__main__":
    B, S, D = 2, 8, 32   # config.dim = 32
    key = jax.random.PRNGKey(0)
    k1, k2, k3 = jax.random.split(key, 3)

    hidden_states = jax.random.normal(k1, (B, S, D), dtype=jnp.float32)
    # Synthetic nn.Linear(D, D) parameters in PyTorch (out, in) layout.
    weight_f32 = jax.random.normal(k2, (D, D), dtype=jnp.float32) * 0.05
    bias = jax.random.normal(k3, (D,), dtype=jnp.float32) * 0.05

    # Parameter-prep step (done ONCE, outside the hot path): store the weight
    # in the bf16 compute dtype so the kernel streams half the bytes.
    weight = weight_f32.astype(jnp.bfloat16)

    out = distilbert_pooler(hidden_states, weight, bias)
    jax.block_until_ready(out)
    assert out.shape == (B, D)
    assert out.dtype == hidden_states.dtype

    # Numerics-matched reference (bf16 operands, f32 accumulation): tight check.
    x_m = hidden_states[:, 0].astype(jnp.bfloat16).astype(jnp.float32)
    w_m = weight.astype(jnp.float32)
    ref_matched = jnp.maximum(x_m @ w_m.T + bias, 0.0)
    assert jnp.allclose(out, ref_matched, atol=1e-3, rtol=1e-3)

    # Full-precision PyTorch-semantics reference: loose check (bf16 weight stream).
    ref_f32 = jnp.maximum(hidden_states[:, 0] @ weight_f32.T + bias, 0.0)
    assert jnp.allclose(out, ref_f32, atol=3e-2, rtol=3e-2)

    print("KERNEL_OK")
</pallas_src>

<mosaic_0001>
module attributes {stable_mosaic.version = 11 : i64} {
  func.func @pooler_kernel(%arg0: i32, %arg1: i32, %arg2: memref<2x32xbf16, #tpu.memory_space<vmem>>, %arg3: memref<32x32xbf16, #tpu.memory_space<vmem>>, %arg4: memref<1x32xf32, #tpu.memory_space<vmem>>, %arg5: memref<2x32xf32, #tpu.memory_space<vmem>>) attributes {dimension_semantics = [#tpu.dimension_semantics<parallel>, #tpu.dimension_semantics<parallel>], iteration_bounds = array<i64: 1, 1>, scalar_prefetch = 0 : i64, scratch_operands = 0 : i64, tpu.core_type = #tpu.core_type<tc>, window_params = [{transform_indices = @transform_0, window_bounds = array<i64: 2, 32>}, {transform_indices = @transform_1, window_bounds = array<i64: 32, 32>}, {transform_indices = @transform_2, window_bounds = array<i64: 1, 32>}, {transform_indices = @transform_3, window_bounds = array<i64: 2, 32>}]} {
    %c0 = arith.constant 0 : index
    %c0_0 = arith.constant 0 : index
    %0 = vector.load %arg2[%c0, %c0_0] : memref<2x32xbf16, #tpu.memory_space<vmem>>, vector<2x32xbf16>
    %c0_1 = arith.constant 0 : index
    %c0_2 = arith.constant 0 : index
    %1 = vector.load %arg3[%c0_1, %c0_2] : memref<32x32xbf16, #tpu.memory_space<vmem>>, vector<32x32xbf16>
    %cst = arith.constant dense<0.000000e+00> : vector<2x32xf32>
    %2 = tpu.matmul %0, %1, %cst {dimension_numbers = #tpu.dot_dimension_numbers<[1], [1], [0], [0], [0, 0, 1, 0], [], []>} : vector<2x32xbf16>, vector<32x32xbf16>, vector<2x32xf32> -> vector<2x32xf32>
    %c0_3 = arith.constant 0 : index
    %c0_4 = arith.constant 0 : index
    %3 = vector.load %arg4[%c0_3, %c0_4] : memref<1x32xf32, #tpu.memory_space<vmem>>, vector<1x32xf32>
    %4 = vector.broadcast %3 : vector<1x32xf32> to vector<2x32xf32>
    %5 = arith.addf %2, %4 : vector<2x32xf32>
    %cst_5 = arith.constant 0.000000e+00 : f32
    %6 = vector.broadcast %cst_5 : f32 to vector<2x32xf32>
    %7 = arith.maximumf %5, %6 : vector<2x32xf32>
    %c0_6 = arith.constant 0 : index
    %c0_7 = arith.constant 0 : index
    %8 = vector.load %arg5[%c0_6, %c0_7] : memref<2x32xf32, #tpu.memory_space<vmem>>, vector<2x32xf32>
    tpu.vector_store %arg5[%c0_6, %c0_7], %7 {strides = array<i32>} : memref<2x32xf32, #tpu.memory_space<vmem>>, vector<2x32xf32>,
    return
  }
  func.func @transform_0(%arg0: i32, %arg1: i32) -> (i32, i32) {
    %c0_i32 = arith.constant 0 : i32
    %c0_i32_0 = arith.constant 0 : i32
    return %arg1, %c0_i32 : i32, i32
  }
  func.func @transform_1(%arg0: i32, %arg1: i32) -> (i32, i32) {
    %c0_i32 = arith.constant 0 : i32
    %c0_i32_0 = arith.constant 0 : i32
    return %arg0, %c0_i32 : i32, i32
  }
  func.func @transform_2(%arg0: i32, %arg1: i32) -> (i32, i32) {
    %c0_i32 = arith.constant 0 : i32
    %c0_i32_0 = arith.constant 0 : i32
    return %c0_i32, %arg0 : i32, i32
  }
  func.func @transform_3(%arg0: i32, %arg1: i32) -> (i32, i32) {
    %c0_i32 = arith.constant 0 : i32
    return %arg1, %arg0 : i32, i32
  }
}

</mosaic_0001>

<bundles_post_ra>
// kernel: tpu_custom_call.1
= control target key start
LH: loop header
LB: loop body
LE: loop exit
PB: predicated region body
PF: predicated region fallthrough
CT: control target
= control target key end

     0   :  { %8 = vsyncpa [#allocation3], 0  ;;  %s302_s0 = inlined_call_operand.hbm [shape: bf16[2,32], index: 0, kind: input, shape index: {}]   ;;  %s303_s1 = inlined_call_operand.hbm [shape: bf16[32,32], index: 1, kind: input, shape index: {}]   ;;  %s304_s2 = inlined_call_operand.vmem [shape: f32[1,32], index: 2, kind: input, shape index: {}]   ;;  %s305_s3 = inlined_call_operand.hbm [shape: f32[2,32], index: 3, kind: output, shape index: {}]  }
   0x1   :  { %9 = vsyncpa [#allocation6], 0 }
   0x2   :  { %10 = vsyncpa [#allocation4], 0  ;;  %s229_s12 = smov [#allocation2]   ;;  %s230_s14 = smov [#allocation5]  }
   0x3   :  { %s17_s13 = sshll.u32 %s229_s12, 4  ;;  %s26_s15 = sshll.u32 %s230_s14, 4  ;;  %s18_s13 = int_to_ptr.vmem [resolvable:$true] %s17_s13  ;;  %s256_s15 = int_to_ptr.vmem [resolvable:$true] %s26_s15 }
   0x4   :  { %s157_s18 = scalar_lea.hbm %s302_s0, 16 }
   0x5   :  { %p158_p0 = scmp.ne.s32.totalorder %s302_s0, %s157_s18  ;;  %p161_p1 = scmp.lt.u32.totalorder %s157_s18, %s302_s0 }
   0x7   :  { %p163_p2 = pnand %p161_p1, %p158_p0 }
   0x9   :  { %166 = shalt.err (!%p163_p2)
}
   0xa   :  { %s167_s23 = scalar_lea.vmem %s18_s13, 16  ;;  %s171_s24 = scalar_lea.vmem %s18_s13, 32 }
   0xb   :  { %p168_p3 = scmp.ne.s32.totalorder %s18_s13, %s167_s23  ;;  %p172_p4 = scmp.lt.s32.totalorder %s18_s13, %s18_s13 }
   0xc   :  { %p173_p5 = scmp.lt.s32.totalorder %s171_s24, %s167_s23 }
   0xe   :  { %p174_p6 = por %p173_p5, %p172_p4 }
  0x10   :  { %p175_p7 = pnand %p174_p6, %p168_p3 }
  0x12   :  { %178 = shalt.err (!%p175_p7)
}
  0x13   :  { %20 = dma.hbm_to_vmem [thread:$0]  %s302_s0, 16, %s18_s13, [#allocation3]  }
  0x14   :  { %s179_s29 = scalar_lea.hbm %s303_s1, 256 }
  0x15   :  { %p180_p8 = scmp.ne.s32.totalorder %s303_s1, %s179_s29  ;;  %p183_p9 = scmp.lt.u32.totalorder %s179_s29, %s303_s1 }
  0x17   :  { %p185_p10 = pnand %p183_p9, %p180_p8 }
  0x19   :  { %188 = shalt.err (!%p185_p10)
}
  0x1a   :  { %s189_s7 = scalar_lea.vmem %s256_s15, 256  ;;  %p194_p12 = scmp.lt.s32.totalorder %s256_s15, %s256_s15 }
  0x1b   :  { %p190_p11 = scmp.ne.s32.totalorder %s256_s15, %s189_s7  ;;  %p195_p13 = scmp.lt.s32.totalorder %s189_s7, %s189_s7 }
  0x1d   :  { %p196_p0 = por %p195_p13, %p194_p12 }
  0x1f   :  { %p197_p1 = pnand %p196_p0, %p190_p11 }
  0x21   :  { %200 = shalt.err (!%p197_p1)
}
  0x22   :  { %s231_s0 = smov 64   ;;  %s232_s8 = smov 4  }
  0x23   :  { %32 = dma.hbm_to_vmem [thread:$0]  %s303_s1, 256, %s256_s15, [#allocation6], %s231_s0, %s231_s0, %s232_s8  }
  0x24   :  { %223 = dma.done.wait [#allocation3], 16  }
  0x25   :  { %224 = vsyncadd [#allocation3], 4294967280 }
  0x26   :  { %225 = dma.done.wait [#allocation6], 256  }
  0x27   :  { %226 = vsyncadd [#allocation6], 4294967040  ;;  %v233_v0 = vmov 0.0   ;;  %vm234_vm0 = vmmov 0   ;;  %vm64_vm1 = vcmask 261120   ;;  %v155_v1 = vld [vmem:[#allocation5] sm:$0xff]  }
  0x28   :  { %140 = vmatprep.subr.bf16.mxu0 %v233_v0  ;;  %144 = vmatprep.mubr.msk.bf16.mxu0 %vm234_vm0, %v233_v0  ;;  %v69_v2 = vsel %vm64_vm1, %v155_v1, 0  ;;  %v156_v3 = vld [vmem:[#allocation5 + $0x8] sm:$0xff]   ;;  %v42_v5 = vld [vmem:[#allocation2] sm:$0x1]  ;;  %s235_s12 = smov [#allocation7]   ;;  %vm115_vm2 = vcmask 254976  }
  0x29   :  { %141 = vmatpush3.bf16.xpose.msra.mxu0 %v69_v2  ;;  %v72_v4 = vsel %vm64_vm1, %v156_v3, 0  ;;  %v133_v6 = vld [vmem:[%s304_s2] ss:$0 sm:$0xff]  ;;  %s123_s13 = sshll.u32 %s235_s12, 4  ;;  %s124_s13 = int_to_ptr.vmem [resolvable:$true] %s123_s13 }
  0x2a   :  { %142 = vmatprep.subr.bf16.mxu0 %v233_v0  ;;  %s201_s14 = scalar_lea.vmem %s124_s13, 32  ;;  %p206_p3 = scmp.lt.s32.totalorder %s124_s13, %s124_s13 }
  0x2b   :  { %p202_p2 = scmp.ne.s32.totalorder %s124_s13, %s201_s14  ;;  %p207_p4 = scmp.lt.s32.totalorder %s201_s14, %s201_s14 }
  0x2d   :  { %p208_p5 = por %p207_p4, %p206_p3 }
  0x2f   :  { %p209_p6 = pnand %p208_p5, %p202_p2 }
  0x31   :  { %143 = vmatpush3.bf16.xpose.msra.mxu0 %v72_v4 }
  0x38   :  { %145 = vmatmul.mubr.msk.bf16.vlgmr.msra.gmra.mrb[0].mxu0 %vm64_vm1, %v42_v5 }
 0x10b   :  { %v108_v7 = vpop.f32.mrb[0].mxu0 }
 0x10c   :  { %v109_v8 = vadd.f32 %v133_v6, %v108_v7  ;;  %v146_v9 = vpop.f32.mrb[1].mxu0 }
 0x10d   :  { %v111_v10 = vpop.f32.mrb[2].mxu0 }
 0x10e   :  { %v114_v11 = vmax.f32 %v109_v8, 0.0  ;;  %v147_v12 = vpop.f32.mrb[3].mxu0 }
 0x110   :  { %116 = vst.msk [vmem:[#allocation7] sm:$0x3] %vm115_vm2, %v114_v11 }
 0x111   :  { %212 = shalt.err (!%p209_p6)
}
 0x112   :  { %s213_s16 = scalar_lea.hbm %s305_s3, 32 }
 0x113   :  { %p214_p7 = scmp.ne.s32.totalorder %s305_s3, %s213_s16  ;;  %p217_p8 = scmp.lt.u32.totalorder %s213_s16, %s305_s3 }
 0x115   :  { %p219_p9 = pnand %p217_p8, %p214_p7 }
 0x117   :  { %222 = shalt.err (!%p219_p9)
}
 0x118   :  { %126 = dma.vmem_to_hbm [thread:$0]  %s124_s13, 32, %s305_s3, [#allocation4]  }
 0x119   :  { %227 = dma.done.wait [#allocation4], 32  }
 0x11a   :  { %228 = vsyncadd [#allocation4], 4294967264 }
 0x11b   :  { %130 = vsyncpa [#allocation3], 1 }
 0x11c   :  { %131 = vsyncpa [#allocation6], 1 }
 0x11d   :  { %132 = vsyncpa [#allocation4], 1 }

</bundles_post_ra>
